<compile_context>
chip_gen: v7x
topology: tpu7x:2x2x1
jax: 0.10.0
libtpu: 0.0.40
codegen_flags: <defaults>
</compile_context>

<pallas_src>
import math

import jax
import jax.numpy as jnp
from jax import lax
from jax.experimental import pallas as pl
from jax.experimental.pallas import tpu as pltpu


# ---------------------------------------------------------------------------
# Kernel bodies
# ---------------------------------------------------------------------------

def _scores(q_ref, k_ref):
    d = q_ref.shape[-1]
    # Fold 1/sqrt(d) into q: Lq*D multiplies instead of Lq*Lk, native dtype.
    q = q_ref[...] * (1.0 / math.sqrt(d))               # (G, tq, D)
    # Q @ K^T contracted directly on D (no explicit transpose), f32 accumulate.
    return lax.dot_general(
        q, k_ref[...],
        dimension_numbers=(((2,), (2,)), ((0,), (0,))),
        preferred_element_type=jnp.float32)              # (G, tq, Lk) f32


def _softmax_pv(scores, v_ref, o_ref, p_ref):
    m = jnp.max(scores, axis=-1, keepdims=True)
    e = jnp.exp(scores - m)
    s = jnp.sum(e, axis=-1, keepdims=True)
    # Exact reciprocal keeps the strict 1e-5 tolerance vs the reference.
    p = e * pl.reciprocal(s, approx=False)               # (G, tq, Lk) f32
    # Normalize once and reuse the same tensor for both outputs and the P.V
    # matmul (saves one (tq,Lk) cast and one (tq,D) multiply per tile).
    p_ref[...] = p.astype(p_ref.dtype)
    o = lax.dot_general(
        p.astype(v_ref.dtype), v_ref[...],
        dimension_numbers=(((2,), (1,)), ((0,), (0,))),
        preferred_element_type=jnp.float32)               # (G, tq, D) f32
    o_ref[...] = o.astype(o_ref.dtype)


def _attn_kernel(q_ref, k_ref, v_ref, o_ref, p_ref):
    _softmax_pv(_scores(q_ref, k_ref), v_ref, o_ref, p_ref)


def _attn_kernel_mask_stream(q_ref, k_ref, v_ref, m_ref, o_ref, p_ref):
    scores = _scores(q_ref, k_ref)
    # int8 mask streamed at native width (4x less HBM than an f32 bias); the
    # compare+select is VPU work hidden under the MXU / EUP slots.  Matches
    # masked_fill semantics exactly (no additive-bias rounding caveat).
    scores = jnp.where(m_ref[...] == 0, jnp.float32(-1e9), scores)
    _softmax_pv(scores, v_ref, o_ref, p_ref)


def _attn_kernel_mask_resident(q_ref, k_ref, v_ref, m_ref, o_ref, p_ref):
    # m_ref holds the whole (1, Lq, Lk) broadcast mask resident in VMEM (its
    # index_map is constant so it is DMA'd exactly once); slice the current
    # query tile here instead of re-streaming a tile every grid step.
    tq = q_ref.shape[1]
    start = pl.multiple_of(pl.program_id(1) * tq, tq)
    mask = m_ref[0, pl.ds(start, tq), :]                  # (tq, Lk) int8
    scores = _scores(q_ref, k_ref)
    scores = jnp.where(mask[None, :, :] == 0, jnp.float32(-1e9), scores)
    _softmax_pv(scores, v_ref, o_ref, p_ref)


# ---------------------------------------------------------------------------
# Planning (generation-aware VMEM budgeting)
# ---------------------------------------------------------------------------

def _vmem_capacity_bytes():
    try:
        return int(pltpu.get_tpu_info().vmem_capacity_bytes)
    except Exception:
        return 64 * 1024 * 1024   # conservative fallback (v7x per-TC size)


def _plan(BH, Lq, Lk, D, in_isz, out_isz, p_isz, mask_mode, budget):
    """Pick (tq, G) so one grid step fits the per-step VMEM budget."""

    def per_head(tq):
        mask_bytes = 2 * tq * Lk if mask_mode in ("stream", "stream_bcast") else 0
        return (2 * (tq * D + 2 * Lk * D) * in_isz     # q + k + v (double-buf)
                + 2 * tq * D * out_isz                 # o output (double-buf)
                + 2 * tq * Lk * p_isz                  # p output (double-buf)
                + 3 * tq * Lk * 4                      # f32 scores / exp / p
                + mask_bytes)                          # streamed int8 mask

    resident = Lq * Lk if mask_mode == "resident" else 0   # int8, fetched once

    # Largest query tile that fits at G=1 (prefer untiled; shrink if needed).
    cands = [Lq] + [t for t in (1024, 512, 256, 128, 64, 32, 16, 8)
                    if t < Lq and Lq % t == 0]
    tq = cands[-1]
    for t in cands:
        if per_head(t) + resident <= budget:
            tq = t
            break
    # TODO(synk): for extremely long Lk even tq=8/G=1 may exceed the budget;
    # that requires a K/V grid axis + online softmax, which conflicts with
    # returning the full p_attention and is not implemented here.

    # Heads per grid step: largest divisor of BH that fits.  Cap at BH//2 so
    # the head axis has >=2 steps and a 2-TC part (v7x) splits the grid on it
    # (keeps the resident K/V fetched exactly once per head group).
    g_cap = max(1, BH // 2) if BH >= 2 else 1
    G = max(1, min(g_cap, BH, (budget - resident) // max(per_head(tq), 1)))
    while BH % G:
        G -= 1
    return tq, G


# ---------------------------------------------------------------------------
# Wrapper
# ---------------------------------------------------------------------------

def attention(query, key, value, mask=None, dropout=None, *,
              p_dtype=None, compute_dtype=None):
    """Pallas equivalent of Attention.forward. Returns (output, p_attention).

    p_dtype: optional dtype for the returned probabilities (e.g. bf16 halves
             the dominant quadratic HBM write).  Defaults to query.dtype.
    compute_dtype: opt-in matmul operand dtype (e.g. bf16 for the fast MXU
             path on every generation); accumulation stays f32.
    """
    # TODO(synk): dropout (a torch.nn.Dropout module in the reference) is not
    # applied; the reference only uses it when a module is passed in.
    assert dropout is None

    B, H, Lq, D = query.shape
    Lk = key.shape[-2]
    BH = B * H

    if compute_dtype is not None:
        query = query.astype(compute_dtype)
        key = key.astype(compute_dtype)
        value = value.astype(compute_dtype)

    out_dtype = query.dtype
    p_dtype = out_dtype if p_dtype is None else jnp.dtype(p_dtype)

    q = query.reshape(BH, Lq, D)
    k = key.reshape(BH, Lk, D)
    v = value.reshape(BH, Lk, D)

    capacity = _vmem_capacity_bytes()
    # Scoped VMEM ~55% of physical leaves headroom for Mosaic internal scratch:
    # v7x -> ~35 MiB of 64; v5e/v6e -> ~70 MiB of 128.
    vmem_limit = int(capacity * 0.55)
    # Per-grid-step working-set budget: v7x ~16 MiB, v5e/v6e ~32 MiB.
    budget = capacity // 4

    # ---- mask preprocessing: int8, no f32 bias materialization in HBM ----
    mask_mode = "none"
    mask_i8 = None
    if mask is not None:
        m4 = jnp.asarray(mask)
        m4 = m4.reshape((1,) * (4 - m4.ndim) + m4.shape)
        Bm, Hm = m4.shape[0], m4.shape[1]
        m_i8 = (m4 != 0).astype(jnp.int8)
        if Bm == 1 and Hm == 1:
            mask_i8 = jnp.broadcast_to(m_i8, (1, 1, Lq, Lk)).reshape(1, Lq, Lk)
            mask_mode = "resident" if Lq * Lk <= budget // 4 else "stream_bcast"
        else:
            mask_i8 = jnp.broadcast_to(m_i8, (B, H, Lq, Lk)).reshape(BH, Lq, Lk)
            mask_mode = "stream"

    tq, G = _plan(BH, Lq, Lk, D, q.dtype.itemsize, out_dtype.itemsize,
                  p_dtype.itemsize, mask_mode, budget)

    grid = (BH // G, Lq // tq)

    qspec = pl.BlockSpec((G, tq, D), lambda g, qi: (g, qi, 0))
    # K/V stay resident across the q-tile axis (index_map ignores qi).
    kspec = pl.BlockSpec((G, Lk, D), lambda g, qi: (g, 0, 0))
    vspec = pl.BlockSpec((G, Lk, D), lambda g, qi: (g, 0, 0))
    ospec = pl.BlockSpec((G, tq, D), lambda g, qi: (g, qi, 0))
    pspec = pl.BlockSpec((G, tq, Lk), lambda g, qi: (g, qi, 0))

    out_shapes = (
        jax.ShapeDtypeStruct((BH, Lq, D), out_dtype),
        jax.ShapeDtypeStruct((BH, Lq, Lk), p_dtype),
    )
    cparams = pltpu.CompilerParams(
        # qi marked "arbitrary" so a 2-TensorCore part (v7x) shards the grid
        # on the head axis -> the resident K/V is fetched once per head group.
        dimension_semantics=("parallel", "arbitrary"),
        vmem_limit_bytes=vmem_limit,
    )

    if mask_mode == "none":
        kernel = _attn_kernel
        in_specs = [qspec, kspec, vspec]
        args = (q, k, v)
    elif mask_mode == "resident":
        kernel = _attn_kernel_mask_resident
        in_specs = [qspec, kspec, vspec,
                    pl.BlockSpec((1, Lq, Lk), lambda g, qi: (0, 0, 0))]
        args = (q, k, v, mask_i8)
    elif mask_mode == "stream_bcast":
        kernel = _attn_kernel_mask_stream
        in_specs = [qspec, kspec, vspec,
                    pl.BlockSpec((1, tq, Lk), lambda g, qi: (0, qi, 0))]
        args = (q, k, v, mask_i8)
    else:  # "stream": per-(batch, head) int8 tiles
        kernel = _attn_kernel_mask_stream
        in_specs = [qspec, kspec, vspec,
                    pl.BlockSpec((G, tq, Lk), lambda g, qi: (g, qi, 0))]
        args = (q, k, v, mask_i8)

    out, p = pl.pallas_call(
        kernel,
        out_shape=out_shapes,
        grid=grid,
        in_specs=in_specs,
        out_specs=(ospec, pspec),
        compiler_params=cparams,
    )(*args)

    return out.reshape(B, H, Lq, D), p.reshape(B, H, Lq, Lk)


# ---------------------------------------------------------------------------
# Reference + self-test
# ---------------------------------------------------------------------------

def _reference(query, key, value, mask=None):
    d = query.shape[-1]
    scores = jnp.einsum("bhqd,bhkd->bhqk", query, key) / math.sqrt(d)
    if mask is not None:
        scores = jnp.where(mask == 0, -1e9, scores)
    p = jax.nn.softmax(scores, axis=-1)
    return jnp.einsum("bhqk,bhkd->bhqd", p, value), p


if __name__ == "__main__":
    key0 = jax.random.PRNGKey(0)
    kq, kk, kv, km1, km2 = jax.random.split(key0, 5)

    B, H, Lq, Lk, D = 2, 2, 8, 8, 32
    query = jax.random.normal(kq, (B, H, Lq, D), dtype=jnp.float32)
    key_ = jax.random.normal(kk, (B, H, Lk, D), dtype=jnp.float32)
    value = jax.random.normal(kv, (B, H, Lk, D), dtype=jnp.float32)
    # Mask broadcast over batch/heads (resident path) and full mask (stream).
    mask_b = (jax.random.uniform(km1, (1, 1, Lq, Lk)) > 0.2).astype(jnp.int32)
    mask_f = (jax.random.uniform(km2, (B, H, Lq, Lk)) > 0.2).astype(jnp.int32)

    # No-mask path.
    out, p = attention(query, key_, value)
    jax.block_until_ready((out, p))
    ref_out, ref_p = _reference(query, key_, value)
    assert jnp.allclose(out, ref_out, atol=1e-5, rtol=1e-5)
    assert jnp.allclose(p, ref_p, atol=1e-5, rtol=1e-5)

    # Broadcast mask path (resident int8 mask block).
    out_m, p_m = attention(query, key_, value, mask=mask_b)
    jax.block_until_ready((out_m, p_m))
    ref_out_m, ref_p_m = _reference(query, key_, value, mask=mask_b)
    assert jnp.allclose(out_m, ref_out_m, atol=1e-5, rtol=1e-5)
    assert jnp.allclose(p_m, ref_p_m, atol=1e-5, rtol=1e-5)

    # Per-(batch, head) mask path (streamed int8 mask tiles).
    out_f, p_f = attention(query, key_, value, mask=mask_f)
    jax.block_until_ready((out_f, p_f))
    ref_out_f, ref_p_f = _reference(query, key_, value, mask=mask_f)
    assert jnp.allclose(out_f, ref_out_f, atol=1e-5, rtol=1e-5)
    assert jnp.allclose(p_f, ref_p_f, atol=1e-5, rtol=1e-5)

    print("KERNEL_OK")
</pallas_src>

<mosaic_0001>
module attributes {stable_mosaic.version = 11 : i64} {
  func.func @_attn_kernel(%arg0: i32, %arg1: i32, %arg2: memref<2x8x32xf32, #tpu.memory_space<vmem>>, %arg3: memref<2x8x32xf32, #tpu.memory_space<vmem>>, %arg4: memref<2x8x32xf32, #tpu.memory_space<vmem>>, %arg5: memref<2x8x32xf32, #tpu.memory_space<vmem>>, %arg6: memref<2x8x8xf32, #tpu.memory_space<vmem>>) attributes {dimension_semantics = [#tpu.dimension_semantics<parallel>, #tpu.dimension_semantics<arbitrary>], iteration_bounds = array<i64: 2, 1>, scalar_prefetch = 0 : i64, scratch_operands = 0 : i64, tpu.core_type = #tpu.core_type<tc>, window_params = [{transform_indices = @transform_0, window_bounds = array<i64: 2, 8, 32>}, {transform_indices = @transform_1, window_bounds = array<i64: 2, 8, 32>}, {transform_indices = @transform_2, window_bounds = array<i64: 2, 8, 32>}, {transform_indices = @transform_3, window_bounds = array<i64: 2, 8, 32>}, {transform_indices = @transform_4, window_bounds = array<i64: 2, 8, 8>}]} {
    %c0 = arith.constant 0 : index
    %c0_0 = arith.constant 0 : index
    %c0_1 = arith.constant 0 : index
    %0 = vector.load %arg2[%c0, %c0_0, %c0_1] : memref<2x8x32xf32, #tpu.memory_space<vmem>>, vector<2x8x32xf32>
    %cst = arith.constant 0.176776692 : f32
    %1 = vector.broadcast %cst : f32 to vector<2x8x32xf32>
    %2 = arith.mulf %0, %1 : vector<2x8x32xf32>
    %c0_2 = arith.constant 0 : index
    %c0_3 = arith.constant 0 : index
    %c0_4 = arith.constant 0 : index
    %3 = vector.load %arg3[%c0_2, %c0_3, %c0_4] : memref<2x8x32xf32, #tpu.memory_space<vmem>>, vector<2x8x32xf32>
    %cst_5 = arith.constant dense<0.000000e+00> : vector<2x8x8xf32>
    %4 = tpu.matmul %2, %3, %cst_5 {dimension_numbers = #tpu.dot_dimension_numbers<[2], [2], [1], [1], [0, 0, 0, 1, 1, 1], [0], [0]>} : vector<2x8x32xf32>, vector<2x8x32xf32>, vector<2x8x8xf32> -> vector<2x8x8xf32>
    %cst_6 = arith.constant dense<0xFF800000> : vector<2x8xf32>
    %5 = vector.multi_reduction <maximumf>, %4, %cst_6 [2] : vector<2x8x8xf32> to vector<2x8xf32>
    %6 = vector.shape_cast %5 : vector<2x8xf32> to vector<2x8x1xf32>
    %7 = vector.broadcast %6 : vector<2x8x1xf32> to vector<2x8x8xf32>
    %8 = arith.subf %4, %7 : vector<2x8x8xf32>
    %9 = math.exp %8 : vector<2x8x8xf32>
    %cst_7 = arith.constant dense<0.000000e+00> : vector<2x8xf32>
    %10 = vector.multi_reduction <add>, %9, %cst_7 [2] : vector<2x8x8xf32> to vector<2x8xf32>
    %11 = vector.shape_cast %10 : vector<2x8xf32> to vector<2x8x1xf32>
    %12 = tpu.reciprocal %11 : vector<2x8x1xf32> -> vector<2x8x1xf32>
    %13 = vector.broadcast %12 : vector<2x8x1xf32> to vector<2x8x8xf32>
    %14 = arith.mulf %9, %13 : vector<2x8x8xf32>
    %c0_8 = arith.constant 0 : index
    %c0_9 = arith.constant 0 : index
    %c0_10 = arith.constant 0 : index
    %15 = vector.load %arg6[%c0_8, %c0_9, %c0_10] : memref<2x8x8xf32, #tpu.memory_space<vmem>>, vector<2x8x8xf32>
    tpu.vector_store %arg6[%c0_8, %c0_9, %c0_10], %14 {strides = array<i32>} : memref<2x8x8xf32, #tpu.memory_space<vmem>>, vector<2x8x8xf32>,
    %c0_11 = arith.constant 0 : index
    %c0_12 = arith.constant 0 : index
    %c0_13 = arith.constant 0 : index
    %16 = vector.load %arg4[%c0_11, %c0_12, %c0_13] : memref<2x8x32xf32, #tpu.memory_space<vmem>>, vector<2x8x32xf32>
    %cst_14 = arith.constant dense<0.000000e+00> : vector<2x8x32xf32>
    %17 = tpu.matmul %14, %16, %cst_14 {dimension_numbers = #tpu.dot_dimension_numbers<[2], [1], [1], [2], [0, 0, 0, 1, 1, 2], [0], [0]>} : vector<2x8x8xf32>, vector<2x8x32xf32>, vector<2x8x32xf32> -> vector<2x8x32xf32>
    %c0_15 = arith.constant 0 : index
    %c0_16 = arith.constant 0 : index
    %c0_17 = arith.constant 0 : index
    %18 = vector.load %arg5[%c0_15, %c0_16, %c0_17] : memref<2x8x32xf32, #tpu.memory_space<vmem>>, vector<2x8x32xf32>
    tpu.vector_store %arg5[%c0_15, %c0_16, %c0_17], %17 {strides = array<i32>} : memref<2x8x32xf32, #tpu.memory_space<vmem>>, vector<2x8x32xf32>,
    return
  }
  func.func @transform_0(%arg0: i32, %arg1: i32) -> (i32, i32, i32) {
    %c0_i32 = arith.constant 0 : i32
    %c0_i32_0 = arith.constant 0 : i32
    return %arg0, %arg1, %c0_i32 : i32, i32, i32
  }
  func.func @transform_1(%arg0: i32, %arg1: i32) -> (i32, i32, i32) {
    %c0_i32 = arith.constant 0 : i32
    %c0_i32_0 = arith.constant 0 : i32
    %c0_i32_1 = arith.constant 0 : i32
    return %arg0, %c0_i32, %c0_i32_0 : i32, i32, i32
  }
  func.func @transform_2(%arg0: i32, %arg1: i32) -> (i32, i32, i32) {
    %c0_i32 = arith.constant 0 : i32
    %c0_i32_0 = arith.constant 0 : i32
    %c0_i32_1 = arith.constant 0 : i32
    return %arg0, %c0_i32, %c0_i32_0 : i32, i32, i32
  }
  func.func @transform_3(%arg0: i32, %arg1: i32) -> (i32, i32, i32) {
    %c0_i32 = arith.constant 0 : i32
    %c0_i32_0 = arith.constant 0 : i32
    return %arg0, %arg1, %c0_i32 : i32, i32, i32
  }
  func.func @transform_4(%arg0: i32, %arg1: i32) -> (i32, i32, i32) {
    %c0_i32 = arith.constant 0 : i32
    %c0_i32_0 = arith.constant 0 : i32
    return %arg0, %arg1, %c0_i32 : i32, i32, i32
  }
}

</mosaic_0001>

<bundles_post_ra>
// kernel: tpu_custom_call.1
= control target key start
LH: loop header
LB: loop body
LE: loop exit
PB: predicated region body
PF: predicated region fallthrough
CT: control target
= control target key end

     0   :  { %s1608_s0 = inlined_call_operand.hbm [shape: f32[4,8,32], index: 0, kind: input, shape index: {}]   ;;  %s1609_s1 = inlined_call_operand.hbm [shape: f32[4,8,32], index: 1, kind: input, shape index: {}]   ;;  %s1610_s2 = inlined_call_operand.hbm [shape: f32[4,8,32], index: 2, kind: input, shape index: {}]   ;;  %s1611_s3 = inlined_call_operand.hbm [shape: f32[4,8,32], index: 3, kind: output, shape index: {0}]   ;;  %s1612_s4 = inlined_call_operand.hbm [shape: f32[4,8,8], index: 4, kind: output, shape index: {1}]  }
   0x1   :  { %1624 = sst [smem:[#allocation19_spill]] %s1609_s1 }
   0x2   :  { %10 = vsyncpa [#allocation3], 0 }
   0x3   :  { %12 = vsyncpa [#allocation3 + $0x1], 0 }
   0x4   :  { %13 = vsyncpa [#allocation6], 0 }
   0x5   :  { %15 = vsyncpa [#allocation6 + $0x1], 0 }
   0x6   :  { %16 = vsyncpa [#allocation4], 0 }
   0x7   :  { %18 = vsyncpa [#allocation4 + $0x1], 0 }
   0x8   :  { %19 = vsyncpa [#allocation10], 0 }
   0x9   :  { %21 = vsyncpa [#allocation10 + $0x1], 0  ;;  %s1264_s15 = smov 0   ;;  %s1266_s16 = smov 0  }
   0xa   :  { %s1268_s17 = smov 0   ;;  %s1270_s18 = smov 0  }
   0xb   :  { %s1272_s19 = smov 0   ;;  %s1274_s20 = smov 0  }
   0xc LB: > { %1625 = sst [smem:[#allocation15_spill]] %s1222_s19  ;;  %s1295_s21 = sadd.s32 4294967295, %s1226_s20   ;;  %s1226_s20 = sphi %s1274_s20, %s27_s20   ;;  %s1222_s19 = sphi %s1272_s19, %s1650_s19   ;;  %s1218_s18 = sphi %s1270_s18, %s1649_s18   ;;  %s1214_s17 = sphi %s1268_s17, %s1653_s17   ;;  %s1210_s16 = sphi %s1266_s16, %s1652_s16   ;;  %s1206_s15 = sphi %s1264_s15, %s1651_s15  }
   0xd   : > { %1626 = sst [smem:[#allocation16_spill]] %s1226_s20  ;;  %s862_s22 = sadd.s32 4294967294, %s1226_s20  }
   0xe   : > { %s39_s23 = sadd.s32 1, %s1222_s19  ;;  %s48_s24 = sadd.s32 1, %s1214_s17 }
   0xf   : > { %p41_p0 = scmp.ge.s32.totalorder %s39_s23, 2  ;;  %p55_p1 = scmp.ne.s32.totalorder %s1214_s17, %s1210_s16 }
  0x10   : > { %p56_p2 = scmp.eq.s32.totalorder %s1226_s20, 0  ;;  %p61_p3 = scmp.ne.s32.totalorder %s1210_s16, %s1206_s15 }
  0x11   : > { %s1655_s23 = smov (%p41_p0, %s39_s23), 0  ;;  %p62_p5 = scmp.eq.s32.totalorder %s1295_s21, 0 }
  0x12   : > { %1627 = sst [smem:[#allocation17_spill]] %s1655_s23  ;;  %p1307_p4 = por %p56_p2, %p55_p1 }
  0x13   : > { %s43_s26 = ssub.s32 %s1222_s19, %s1655_s23  ;;  %p139_p6 = scmp.eq.s32.totalorder %s1295_s21, 1 }
  0x14   : > { %p46_p7 = scmp.eq.s32.totalorder %s43_s26, 0  ;;  %p1315_p8 = por %p62_p5, %p61_p3 }
  0x15   : > { %p1319_p9 = por %p139_p6, %p55_p1  ;;  %p145_p10 = scmp.eq.s32.totalorder %s862_s22, 1 }
  0x16   : > { %s1629_s27 = scalar_select %p1315_p8, 1, 0 }
  0x17   : > { %s1630_s28 = scalar_select %p1319_p9, 1, 0 }
  0x18   : > { %s1324_s29 = scalar_select %p46_p7, %s1214_s17, %s48_s24  }
  0x19   : > { %p1326_p11 = por %p145_p10, %p61_p3  ;;  %p954_p13 = scmp.lt.s32.totalorder %s1226_s20, 2 }
  0x1a   : > { %1631 = sst [smem:[#allocation18_spill]] %s1324_s29  ;;  %s1613_s5 = sand.u32 1, %s1214_s17  }
  0x1b   : > { %s1632_s30 = scalar_select %p1326_p11, 1, 0 }
  0x1c   : > { %s1335_s6 = sshll.u32 %s1613_s5, 4  ;;  %s1338_s7 = sshll.u32 %s1222_s19, 8 }
  0x1d   : > { %p1342_p0 = pnand %p954_p13, %p1307_p4  ;;  %s215_s9 = sand.u32 1, %s1226_s20  }
  0x1e   : > { %s1634_s1 = sld [smem:[#allocation19_spill]]  ;;  %s219_s13 = scalar_lea.vmem [#allocation5], %s1335_s6 }
  0x1f   : > { %s226_s14 = sshll.u32 %s219_s13, 4  ;;  %s1358_s22 = scalar_lea.sflag [#allocation6], %s215_s9  ;;  %s1355_s14 = int_to_ptr.vmem [resolvable:$true] %s226_s14 }
  0x20   : > { %p1364_p4 = pneg %p1342_p0 }
  0x24   : > { %s1351_s12 = scalar_lea.hbm %s1634_s1, %s1338_s7  ;;  %s1023_s11 = scalar_lea.hbm %s1634_s1, 512 }
  0x25   : > { %s1018_s24 = scalar_lea.hbm %s1351_s12, 256  ;;  %p1024_p7 = scmp.lt.u32.totalorder %s1351_s12, %s1634_s1 }
  0x26   : > { %p1019_p3 = scmp.ne.s32.totalorder %s1351_s12, %s1018_s24  ;;  %p1025_p10 = scmp.lt.u32.totalorder %s1023_s11, %s1018_s24 }
  0x27   : > { %p1027_p12 = scmp.lt.u32.totalorder %s1018_s24, %s1351_s12 }
  0x28   : > { %p1021_p5 = pnand %p1364_p4, %p1019_p3  ;;  %p1026_p13 = por %p1025_p10, %p1024_p7 }
  0x2a   : > { %p1022_p6 = pneg %p1021_p5  ;;  %p1028_p1 = por %p1027_p12, %p1026_p13 }
  0x2c   : > { %p1029_p2 = pnand %p1028_p1, %p1022_p6 }
  0x2e   : > { %1032 = shalt.err (!%p1029_p2)
}
  0x2f   : > { %s1033_s9 = scalar_lea.vmem %s1355_s14, 256  ;;  %s1228_s26 = smov [#allocation5]  }
  0x30   : > { %p1034_p3 = scmp.ne.s32.totalorder %s1355_s14, %s1033_s9  ;;  %s1038_s10 = sshll.u32 %s1228_s26, 4  ;;  %s1039_s10 = int_to_ptr.vmem [resolvable:$false] %s1038_s10 }
  0x31   : > { %s1040_s5 = scalar_lea.vmem %s1039_s10, 512  ;;  %p1041_p9 = scmp.lt.s32.totalorder %s1355_s14, %s1039_s10 }
  0x32   : > { %p1036_p5 = pnand %p1034_p3, %p1364_p4  ;;  %p1042_p8 = scmp.lt.s32.totalorder %s1040_s5, %s1033_s9 }
  0x34   : > { %p1037_p11 = pneg %p1036_p5  ;;  %p1043_p7 = por %p1042_p8, %p1041_p9 }
  0x36   : > { %p1044_p10 = pnand %p1043_p7, %p1037_p11 }
  0x38   : > { %1047 = shalt.err (!%p1044_p10)
}
  0x39   : > { %s1616_s24 = smov 128   ;;  %s1618_s11 = smov 8  }
  0x3a   : > { %943 = dma.hbm_to_vmem [thread:$0]  (!%p1342_p0), %s1351_s12, 256, %s1355_s14, %s1358_s22, %s1616_s24, %s1616_s24, %s1618_s11  }
  0x3b   : > { %p1636_p8 = scmp.lt.s32.totalorder %s1226_s20, 3  ;;  %p1637_p9 = scmp.ge.s32.totalorder %s1226_s20, 1 }
  0x3c   : > { %s1403_s10 = scalar_lea.hbm %s1608_s0, %s1338_s7  ;;  %s197_s5 = scalar_lea.vmem [#allocation2], %s1335_s6 }
  0x3d   : > { %p1395_p11 = pnand %p1637_p9, %p1636_p8  ;;  %s205_s1 = sshll.u32 %s197_s5, 4  ;;  %s1406_s1 = int_to_ptr.vmem [resolvable:$true] %s205_s1 }
  0x3e   : > { %s1412_s24 = scalar_lea.hbm %s1610_s2, %s1338_s7  ;;  %s1639_s11 = sand.u32 1, %s1214_s17  }
  0x3f   : > { %s1638_s13 = scalar_select %p1395_p11, 1, 0 }
  0x40   : > { %s1416_s23 = scalar_lea.sflag [#allocation3], %s1639_s11  ;;  %s1048_s19 = scalar_lea.hbm %s1403_s10, 256 }
  0x41   : > { %p1049_p12 = scmp.ne.s32.totalorder %s1403_s10, %s1048_s19  ;;  %s1053_s29 = scalar_lea.hbm %s1608_s0, 512 }
  0x42   : > { %p1054_p6 = scmp.lt.u32.totalorder %s1403_s10, %s1608_s0  ;;  %p1055_p13 = scmp.lt.u32.totalorder %s1053_s29, %s1048_s19 }
  0x43   : > { %p1051_p1 = pnand %p1049_p12, %p1364_p4  ;;  %p1057_p5 = scmp.lt.u32.totalorder %s1048_s19, %s1403_s10 }
  0x44   : > { %p1056_p3 = por %p1055_p13, %p1054_p6 }
  0x45   : > { %p1052_p2 = pneg %p1051_p1 }
  0x46   : > { %p1058_p7 = por %p1057_p5, %p1056_p3 }
  0x48   : > { %p1059_p10 = pnand %p1058_p7, %p1052_p2 }
  0x4a   : > { %1062 = shalt.err (!%p1059_p10)
}
  0x4b   : > { %s1063_s7 = scalar_lea.vmem %s1406_s1, 256  ;;  %s1231_s11 = smov [#allocation2]  }
  0x4c   : > { %p1064_p8 = scmp.ne.s32.totalorder %s1406_s1, %s1063_s7  ;;  %s1068_s12 = sshll.u32 %s1231_s11, 4  ;;  %s1069_s12 = int_to_ptr.vmem [resolvable:$false] %s1068_s12 }
  0x4d   : > { %s1070_s20 = scalar_lea.vmem %s1069_s12, 512  ;;  %p1071_p1 = scmp.lt.s32.totalorder %s1406_s1, %s1069_s12 }
  0x4e   : > { %p1066_p9 = pnand %p1064_p8, %p1364_p4  ;;  %p1072_p11 = scmp.lt.s32.totalorder %s1070_s20, %s1063_s7 }
  0x50   : > { %p1067_p12 = pneg %p1066_p9  ;;  %p1073_p6 = por %p1072_p11, %p1071_p1 }
  0x52   : > { %p1074_p13 = pnand %p1073_p6, %p1067_p12 }
  0x54   : > { %1077 = shalt.err (!%p1074_p13)
}
  0x55   : > { %s1640_s19 = smov 8   ;;  %s1641_s29 = smov 128  }
  0x56   : > { %940 = dma.hbm_to_vmem [thread:$0]  (!%p1342_p0), %s1403_s10, 256, %s1406_s1, %s1416_s23, %s1641_s29, %s1641_s29, %s1640_s19  }
  0x57   : > { %s240_s14 = scalar_lea.vmem [#allocation7], %s1335_s6  ;;  %s1078_s26 = scalar_lea.hbm %s1412_s24, 256 }
  0x58   : > { %s247_s9 = sshll.u32 %s240_s14, 4  ;;  %p1079_p11 = scmp.ne.s32.totalorder %s1412_s24, %s1078_s26  ;;  %s1444_s9 = int_to_ptr.vmem [resolvable:$true] %s247_s9 }
  0x59   : > { %s1083_s11 = scalar_lea.hbm %s1610_s2, 512  ;;  %p1084_p5 = scmp.lt.u32.totalorder %s1412_s24, %s1610_s2 }
  0x5a   : > { %p1081_p2 = pnand %p1079_p11, %p1364_p4  ;;  %p1085_p7 = scmp.lt.u32.totalorder %s1083_s11, %s1078_s26 }
  0x5b   : > { %p1087_p8 = scmp.lt.u32.totalorder %s1078_s26, %s1412_s24 }
  0x5c   : > { %p1082_p3 = pneg %p1081_p2  ;;  %p1086_p10 = por %p1085_p7, %p1084_p5 }
  0x5e   : > { %p1088_p9 = por %p1087_p8, %p1086_p10 }
  0x60   : > { %p1089_p12 = pnand %p1088_p9, %p1082_p3 }
  0x62   : > { %1092 = shalt.err (!%p1089_p12)
}
  0x63   : > { %s1093_s1 = scalar_lea.vmem %s1444_s9, 256  ;;  %s1232_s23 = smov [#allocation7]  }
  0x64   : > { %p1094_p1 = scmp.ne.s32.totalorder %s1444_s9, %s1093_s1  ;;  %s1098_s6 = sshll.u32 %s1232_s23, 4  ;;  %s1099_s6 = int_to_ptr.vmem [resolvable:$false] %s1098_s6 }
  0x65   : > { %s1100_s10 = scalar_lea.vmem %s1099_s6, 512  ;;  %p1101_p11 = scmp.lt.s32.totalorder %s1444_s9, %s1099_s6 }
  0x66   : > { %p1096_p6 = pnand %p1094_p1, %p1364_p4  ;;  %p1102_p2 = scmp.lt.s32.totalorder %s1100_s10, %s1093_s1 }
  0x68   : > { %p1097_p13 = pneg %p1096_p6  ;;  %p1103_p5 = por %p1102_p2, %p1101_p11 }
  0x6a   : > { %p1104_p7 = pnand %p1103_p5, %p1097_p13 }
  0x6c   : > { %1107 = shalt.err (!%p1104_p7)
}
  0x6d   : > { %946 = dma.hbm_to_vmem [thread:$0]  (!%p1342_p0), %s1412_s24, 256, %s1444_s9, %s1358_s22, %s1641_s29, %s1641_s29, %s1640_s19  }
  0x6e   : > { %p1642_p4 = scmp.ne.s32.totalorder %s1638_s13, 0 }
  0x6f   : > { %s1474_s25 = sand.u32 (!%p1642_p4), 1, %s1210_s16   ;;  %p1643_p3 = scmp.ne.s32.totalorder (!%p1642_p4), %s1629_s27, 0 }
  0x70   : > { %259 = sbr.rel (%p1642_p4) target bundleno = 885 (0x375), region = 32  ;;  %s1477_s14 = sshll.u32 (!%p1642_p4), %s1474_s25, 4 }
  0x71   : > { %s262_s8 = scalar_lea.sflag (!%p1642_p4), [#allocation3], %s1474_s25  ;;  %s265_s26 = scalar_lea.vmem (!%p1642_p4), [#allocation2], %s1477_s14 }
  0x77   : > { %1189 = dma.done.wait (%p1643_p3), %s262_s8, 256  }
  0x78   : > { %1191 = vsyncadd (%p1643_p3), %s262_s8, 4294967040  ;;  %s270_s22 = sand.u32 1, %s1295_s21   ;;  %s274_s13 = scalar_lea.vmem [#allocation5], %s1477_s14 }
  0x79   : > { %s271_s24 = scalar_lea.sflag [#allocation6], %s270_s22 }
  0x7a   : > { %1193 = dma.done.wait (%p1643_p3), %s271_s24, 512  }
  0x7b   : > { %1195 = vsyncadd (%p1643_p3), %s271_s24, 4294966784  ;;  %v1233_v0 = vmov 0.0   ;;  %vm1234_vm0 = vmmov 0   ;;  %vm334_vm1 = vcmask 261120   ;;  %v332_v1 = vld [vmem:[%s274_s13] sm:$0xff]  ;;  %v333_v3 = vld [vmem:[%s274_s13 + $0x8] sm:$0xff] }
  0x7c   : > { %907 = vmatprep.subr.mxu0 %v1233_v0  ;;  %909 = vmatprep.mubr.msk.f32.mxu0 %vm1234_vm0, %v1233_v0  ;;  %v328_v2 = vld [vmem:[%s265_s26] sm:$0xff]  ;;  %v329_v5 = vld [vmem:[%s265_s26 + $0x8] sm:$0xff]  ;;  %vm487_vm2 = vcmask 64512   ;;  %s283_s21 = scalar_lea.vmem [#allocation7], %s1477_s14  ;;  %s322_s27 = scalar_lea.vmem [#allocation9], %s1477_s14 }
  0x7d   : > { %912 = vmatprep.subr.mxu1 %v1233_v0  ;;  %914 = vmatprep.mubr.msk.f32.mxu1 %vm1234_vm0, %v1233_v0  ;;  %v330_v4 = vmul.f32 0.17677669, %v328_v2  ;;  %v331_v6 = vmul.f32 0.17677669, %v329_v5  ;;  %v512_v23 = vld [vmem:[%s283_s21] sm:$0xff]  ;;  %v513_v24 = vld [vmem:[%s283_s21 + $0x8] sm:$0xff] }
  0x7e   : > { %908 = vmatpush3.xpose.msk.msra.mxu0 %vm334_vm1, %v332_v1  ;;  %913 = vmatpush3.xpose.msk.msra.mxu1 %vm334_vm1, %v333_v3  ;;  %s897_s19 = sshll.u32 %s1218_s18, 8  ;;  %s699_s29 = sshll.u32 %s322_s27, 4  ;;  %s1517_s29 = int_to_ptr.vmem [resolvable:$true] %s699_s29 }
  0x7f   : > { %917 = vmatprep.subr.mxu0 %v1233_v0  ;;  %922 = vmatprep.subr.mxu1 %v1233_v0  ;;  %s1515_s7 = scalar_lea.hbm %s1612_s4, %s897_s19  ;;  %s668_s11 = scalar_lea.sflag [#allocation10], %s1474_s25 }
  0x80   : > { %s1108_s12 = scalar_lea.vmem %s1517_s29, 256  ;;  %p1644_p10 = scmp.ne.s32.totalorder %s1630_s28, 0 }
  0x81   : > { %910 = vmatmul.mubr.msk.f32.vlgmr.msra.gmra.mrb[0].mxu0 %vm334_vm1, %v330_v4  ;;  %915 = vmatmul.mubr.msk.f32.vlgmr.msra.gmra.mrb[0].mxu1 %vm334_vm1, %v331_v6  ;;  %p1109_p0 = scmp.ne.s32.totalorder %s1517_s29, %s1108_s12  ;;  %s1235_s20 = smov [#allocation9]  }
  0x82   : > { %919 = vmatprep.mubr.msk.f32.mxu0 %vm1234_vm0, %v1233_v0  ;;  %924 = vmatprep.mubr.msk.f32.mxu1 %vm1234_vm0, %v1233_v0  ;;  %s1112_s1 = sshll.u32 %s1235_s20, 4  ;;  %s1113_s1 = int_to_ptr.vmem [resolvable:$false] %s1112_s1 }
  0x83   : > { %918 = vmatpush3.msra.mxu0 %v512_v23  ;;  %923 = vmatpush3.msra.mxu1 %v513_v24  ;;  %p1110_p8 = pnand %p1109_p0, %p1644_p10  ;;  %s1114_s23 = scalar_lea.vmem %s1113_s1, 512 }
  0x84   : > { %p1115_p12 = scmp.lt.s32.totalorder %s1517_s29, %s1113_s1  ;;  %p1116_p1 = scmp.lt.s32.totalorder %s1114_s23, %s1108_s12 }
  0x85   : > { %p1111_p9 = pneg %p1110_p8 }
  0x86   : > { %p1117_p6 = por %p1116_p1, %p1115_p12 }
  0x88   : > { %p1118_p13 = pnand %p1117_p6, %p1111_p9 }
 0x154   : > { %v407_v7 = vpop.f32.mrb[0].mxu0  ;;  %v483_v8 = vpop.f32.mrb[0].mxu1 }
 0x155   : > { %v911_v9 = vpop.f32.mrb[1].mxu0  ;;  %v488_v10 = vsel %vm487_vm2, %v407_v7, -inf  ;;  %v916_v11 = vpop.f32.mrb[1].mxu1  ;;  %v491_v12 = vsel %vm487_vm2, %v483_v8, -inf }
 0x156   : > { %489 = vmax.xlane.f32.xlu0 %v488_v10 }
 0x15a   : > { %492 = vmax.xlane.f32.xlu0 %v491_v12 }
 0x1e3   : > { %v490_v13 = vpop.xlane.xlu0 %489 }
 0x1e4   : > { %v494_v14 = vsub.f32 %v407_v7, %v490_v13 }
 0x1e6   : > { %v496_v15 = vmul.f32 1.442695, %v494_v14 }
 0x1e7   : > { %v493_v16 = vpop.xlane.xlu0 %492 }
 0x1e8   : > { %1010 = vpow2.f32 %v496_v15  ;;  %v495_v17 = vsub.f32 %v483_v8, %v493_v16 }
 0x1ea   : > { %v498_v18 = vmul.f32 1.442695, %v495_v17 }
 0x1ec   : > { %1012 = vpow2.f32 %v498_v18 }
 0x1f2   : > { %v1011_v19 = vpop.eup %1010 }
 0x1f3   : > { %v500_v20 = vsel %vm487_vm2, %v1011_v19, 0.0 }
 0x1f4   : > { %501 = vadd.xlane.f32.xlu1 %v500_v20 }
 0x1f6   : > { %v1013_v21 = vpop.eup %1012 }
 0x1f7   : > { %v503_v22 = vsel %vm487_vm2, %v1013_v21, 0.0 }
 0x1f8   : > { %504 = vadd.xlane.f32.xlu1 %v503_v22 }
 0x281   : > { %v502_v25 = vpop.xlane.xlu1 %501 }
 0x282   : > { %1014 = vrcp.f32 %v502_v25 }
 0x285   : > { %v505_v26 = vpop.xlane.xlu1 %504 }
 0x286   : > { %1016 = vrcp.f32 %v505_v26 }
 0x28c   : > { %v1015_v27 = vpop.eup %1014 }
 0x28d   : > { %v508_v28 = vmul.f32 %v1015_v27, %v1011_v19 }
 0x28f   : > { %920 = vmatmul.mubr.msk.f32.vlgmr.msra.gmra.mrb[2].mxu0 %vm487_vm2, %v508_v28  ;;  %510 = vst.msk [vmem:[%s322_s27] sm:$0xff] %vm487_vm2, %v508_v28 }
 0x290   : > { %v1017_v29 = vpop.eup %1016 }
 0x291   : > { %v509_v30 = vmul.f32 %v1017_v29, %v1013_v21 }
 0x293   : > { %925 = vmatmul.mubr.msk.f32.vlgmr.msra.gmra.mrb[2].mxu1 %vm487_vm2, %v509_v30  ;;  %511 = vst.msk [vmem:[%s322_s27 + $0x8] sm:$0xff] %vm487_vm2, %v509_v30 }
 0x294   : > { %1121 = shalt.err (!%p1118_p13)
}
 0x295   : > { %s1122_s6 = scalar_lea.hbm %s1515_s7, 256  ;;  %s1126_s26 = scalar_lea.hbm %s1612_s4, 512 }
 0x296   : > { %p1123_p11 = scmp.ne.s32.totalorder %s1515_s7, %s1122_s6  ;;  %p1127_p7 = scmp.lt.u32.totalorder %s1515_s7, %s1612_s4 }
 0x297   : > { %p1128_p4 = scmp.lt.u32.totalorder %s1126_s26, %s1122_s6  ;;  %p1130_p0 = scmp.lt.u32.totalorder %s1122_s6, %s1515_s7 }
 0x298   : > { %p1124_p2 = pnand %p1123_p11, %p1644_p10 }
 0x299   : > { %p1129_p3 = por %p1128_p4, %p1127_p7 }
 0x29a   : > { %p1125_p5 = pneg %p1124_p2 }
 0x29b   : > { %p1131_p8 = por %p1130_p0, %p1129_p3 }
 0x29d   : > { %p1132_p9 = pnand %p1131_p8, %p1125_p5 }
 0x29f   : > { %1135 = shalt.err (!%p1132_p9)
}
 0x2a0   : > { %s1236_s13 = smov 128   ;;  %s1237_s21 = smov 8  }
 0x2a1   : > { %934 = dma.vmem_to_hbm [thread:$0]  (%p1644_p10), %s1517_s29, 256, %s1515_s7, %s668_s11, %s1236_s13, %s1236_s13, %s1237_s21  }
 0x2a2   : > { %s315_s27 = scalar_lea.vmem [#allocation8], %s1477_s14  ;;  %s1555_s20 = scalar_lea.hbm %s1611_s3, %s897_s19 }
 0x2a3   : > { %s682_s9 = sshll.u32 %s315_s27, 4  ;;  %s663_s14 = scalar_lea.sflag [#allocation4], %s1474_s25  ;;  %s1548_s9 = int_to_ptr.vmem [resolvable:$true] %s682_s9 }
 0x2a4   : > { %s1136_s29 = scalar_lea.vmem %s1548_s9, 256  ;;  %s1238_s7 = smov [#allocation8]  }
 0x2a5   : > { %p1137_p12 = scmp.ne.s32.totalorder %s1548_s9, %s1136_s29  ;;  %s1140_s18 = sshll.u32 %s1238_s7, 4  ;;  %s1141_s18 = int_to_ptr.vmem [resolvable:$false] %s1140_s18 }
 0x2a6   : > { %s1142_s11 = scalar_lea.vmem %s1141_s18, 512  ;;  %p1143_p13 = scmp.lt.s32.totalorder %s1548_s9, %s1141_s18 }
 0x2a7   : > { %p1138_p1 = pnand %p1137_p12, %p1644_p10  ;;  %p1144_p11 = scmp.lt.s32.totalorder %s1142_s11, %s1136_s29 }
 0x2a9   : > { %p1139_p6 = pneg %p1138_p1  ;;  %p1145_p2 = por %p1144_p11, %p1143_p13 }
 0x2ab   : > { %p1146_p5 = pnand %p1145_p2, %p1139_p6 }
 0x362   : > { %v583_v31 = vpop.f32.mrb[2].mxu0 }
 0x363   : > { %660 = vst.msk [vmem:[%s315_s27] sm:$0xff] %vm334_vm1, %v583_v31  ;;  %v921_v32 = vpop.f32.mrb[3].mxu0 }
 0x366   : > { %v656_v33 = vpop.f32.mrb[2].mxu1 }
 0x367   : > { %661 = vst.msk [vmem:[%s315_s27 + $0x8] sm:$0xff] %vm334_vm1, %v656_v33  ;;  %v926_v34 = vpop.f32.mrb[3].mxu1 }
 0x368   : > { %1149 = shalt.err (!%p1146_p5)
}
 0x369   : > { %s1150_s19 = scalar_lea.hbm %s1555_s20, 256  ;;  %s1154_s6 = scalar_lea.hbm %s1611_s3, 512 }
 0x36a   : > { %p1151_p7 = scmp.ne.s32.totalorder %s1555_s20, %s1150_s19  ;;  %p1155_p0 = scmp.lt.u32.totalorder %s1555_s20, %s1611_s3 }
 0x36b   : > { %p1156_p8 = scmp.lt.u32.totalorder %s1154_s6, %s1150_s19  ;;  %p1158_p12 = scmp.lt.u32.totalorder %s1150_s19, %s1555_s20 }
 0x36c   : > { %p1152_p4 = pnand %p1151_p7, %p1644_p10 }
 0x36d   : > { %p1157_p9 = por %p1156_p8, %p1155_p0 }
 0x36e   : > { %p1153_p3 = pneg %p1152_p4 }
 0x36f   : > { %p1159_p1 = por %p1158_p12, %p1157_p9 }
 0x371   : > { %p1160_p6 = pnand %p1159_p1, %p1153_p3 }
 0x373   : > { %1163 = shalt.err (!%p1160_p6)
}
 0x374   : > { %933 = dma.vmem_to_hbm [thread:$0]  (%p1644_p10), %s1548_s9, 256, %s1555_s20, %s663_s14, %s1236_s13, %s1236_s13, %s1237_s21  }
 0x375 PF: > { %s1645_s26 = sld [smem:[#allocation16_spill]]  ;;  %s714_s22 = sand.u32 1, %s1206_s15  }
 0x376   : > { %p1646_p13 = scmp.ne.s32.totalorder %s1632_s30, 0  ;;  %s715_s24 = scalar_lea.sflag [#allocation4], %s714_s22 }
 0x37b   : > { %p1647_p11 = scmp.ge.s32.totalorder %s1645_s26, 2 }
 0x37d   : > { %p948_p2 = pnand %p1647_p11, %p1646_p13 }
 0x37f   : > { %1197 = dma.done.wait (!%p948_p2), %s715_s24, 256  }
 0x380   : > { %1199 = vsyncadd (!%p948_p2), %s715_s24, 4294967040  ;;  %s724_s28 = scalar_lea.sflag [#allocation10], %s714_s22 }
 0x381   : > { %1201 = dma.done.wait (!%p948_p2), %s724_s28, 256  }
 0x382   : > { %1203 = vsyncadd (!%p948_p2), %s724_s28, 4294967040  ;;  %s27_s20 = sadd.s32 1, %s1645_s26   ;;  %s1648_s25 = sld [smem:[#allocation18_spill]] }
 0x383   : > { %p24_p5 = scmp.ge.s32.totalorder %s27_s20, 4   ;;  %s1649_s18 = sld [smem:[#allocation15_spill]] }
 0x384   : > { %s1650_s19 = sld [smem:[#allocation17_spill]]  ;;  %s1651_s15 = smov %s1210_s16 }
 0x385   : > { %s1652_s16 = smov %s1214_s17  ;;  %26 = sbr.rel (!%p24_p5) target bundleno = 12 (0xc), region = 118 }
 0x388   : > { %s1653_s17 = smov %s1648_s25 }
 0x38c   :  { %729 = vsyncpa [#allocation3], 1 }
 0x38d   :  { %731 = vsyncpa [#allocation3 + $0x1], 1 }
 0x38e   :  { %732 = vsyncpa [#allocation6], 1 }
 0x38f   :  { %734 = vsyncpa [#allocation6 + $0x1], 1 }
 0x390   :  { %735 = vsyncpa [#allocation4], 1 }
 0x391   :  { %737 = vsyncpa [#allocation4 + $0x1], 1 }
 0x392   :  { %738 = vsyncpa [#allocation10], 1 }
 0x393   :  { %740 = vsyncpa [#allocation10 + $0x1], 1 }

</bundles_post_ra>
